<compile_context>
chip_gen: v5e
topology: v5e:2x2
jax: 0.10.0
libtpu: 0.0.40
codegen_flags: <defaults>
</compile_context>

<pallas_src>
import functools

import jax
import jax.numpy as jnp
from jax.experimental import pallas as pl
from jax.experimental.pallas import tpu as pltpu


_VMEM_LIMIT_BYTES = 48 * 1024 * 1024    # scoped-VMEM limit; safe on v5e/v6e/v7x
_PER_BUFFER_BUDGET = 12 * 1024 * 1024   # per input buffer (x2 for double-buffering)


def _round_down(x, m):
    return (x // m) * m


def _sublane_multiple(dtype):
    itemsize = jnp.dtype(dtype).itemsize
    if itemsize >= 4:
        return 8      # f32
    if itemsize == 2:
        return 16     # bf16 packs 2 rows / sublane
    return 32         # int8 / fp8


# ---------------------------------------------------------------------------
# Fast path: full-HW rows.  1-D grid over row blocks, pure streaming reduce.
# ---------------------------------------------------------------------------
def _gap_rows_kernel(x_ref, o_ref, *, inv_hw):
    x = x_ref[...].astype(jnp.float32)
    o_ref[...] = (jnp.sum(x, axis=-1, keepdims=True) * inv_hw).astype(o_ref.dtype)


# ---------------------------------------------------------------------------
# Fallback: HW split across a trailing reduction axis, f32 VMEM accumulator.
# ---------------------------------------------------------------------------
def _gap_reduce_kernel(x_ref, o_ref, acc_ref, *, hw, tile_hw, needs_mask, inv_hw):
    h = pl.program_id(1)
    last = pl.num_programs(1) - 1

    @pl.when(h == 0)
    def _():
        acc_ref[...] = jnp.zeros_like(acc_ref)

    if needs_mask:
        # Only the final HW tile pays for the OOB mask; all other tiles are
        # pure vld + vadd (DMA-bound).
        @pl.when(h < last)
        def _():
            acc_ref[...] += jnp.sum(
                x_ref[...].astype(jnp.float32), axis=-1, keepdims=True)

        @pl.when(h == last)
        def _():
            x = x_ref[...].astype(jnp.float32)
            lane = jax.lax.broadcasted_iota(jnp.int32, x.shape, 1) + h * tile_hw
            x = jnp.where(lane < hw, x, 0.0)
            acc_ref[...] += jnp.sum(x, axis=-1, keepdims=True)
    else:
        acc_ref[...] += jnp.sum(
            x_ref[...].astype(jnp.float32), axis=-1, keepdims=True)

    @pl.when(h == last)
    def _():
        o_ref[...] = (acc_ref[...] * inv_hw).astype(o_ref.dtype)


def global_avg_pool2d(x, *, per_buffer_budget=_PER_BUFFER_BUDGET):
    """Equivalent of F.avg_pool2d(x, (H, W)).view(N, C) for NCHW input."""
    N, C, H, W = x.shape
    RC = N * C
    HW = H * W
    itemsize = jnp.dtype(x.dtype).itemsize
    sub = _sublane_multiple(x.dtype)

    x2 = x.reshape(RC, HW)

    # Keep >= 2 blocks on the "parallel" row axis when RC is large enough so
    # both TensorCores on v7x get work; otherwise take the full extent.
    if RC >= 2 * sub:
        parallel_cap = max(_round_down(-(-RC // 2), sub), sub)
    else:
        parallel_cap = RC

    cost = pl.CostEstimate(
        flops=RC * HW,
        transcendentals=0,
        bytes_accessed=RC * HW * itemsize + RC * itemsize,
    )

    full_hw_rows_fit = per_buffer_budget // max(HW * itemsize, 1)

    if full_hw_rows_fit >= min(sub, RC):
        # ---------------- Fast path: full-HW contiguous row slabs -----------
        tile_rc = min(RC, parallel_cap, full_hw_rows_fit)
        if tile_rc < RC:
            tile_rc = max(_round_down(tile_rc, sub), sub)
        grid = (pl.cdiv(RC, tile_rc),)

        kernel = functools.partial(_gap_rows_kernel, inv_hw=1.0 / HW)
        out = pl.pallas_call(
            kernel,
            out_shape=jax.ShapeDtypeStruct((RC, 1), x.dtype),
            grid_spec=pltpu.PrefetchScalarGridSpec(
                num_scalar_prefetch=0,
                grid=grid,
                in_specs=[pl.BlockSpec((tile_rc, HW), lambda r: (r, 0))],
                out_specs=pl.BlockSpec((tile_rc, 1), lambda r: (r, 0)),
            ),
            compiler_params=pltpu.CompilerParams(
                dimension_semantics=("parallel",),
                vmem_limit_bytes=_VMEM_LIMIT_BYTES,
            ),
            cost_estimate=cost,
        )(x2)
    else:
        # ---------------- Fallback: split HW across a reduction axis --------
        tile_rc = min(RC, parallel_cap, 512)
        if tile_rc < RC:
            tile_rc = max(_round_down(tile_rc, sub), sub)

        hw_fit = max(per_buffer_budget // (tile_rc * itemsize), 128)
        tile_hw = max(_round_down(min(hw_fit, HW), 128), 128)
        if HW % tile_hw != 0:
            # Prefer a 128-multiple that divides HW (mask-free) while keeping
            # the per-row contiguous chunk >= ~2 KiB.
            min_hw = max(2048 // itemsize, 128)
            t = tile_hw
            for _ in range(64):
                t -= 128
                if t < min_hw:
                    break
                if HW % t == 0:
                    tile_hw = t
                    break
        needs_mask = (HW % tile_hw) != 0

        grid = (pl.cdiv(RC, tile_rc), pl.cdiv(HW, tile_hw))
        kernel = functools.partial(
            _gap_reduce_kernel,
            hw=HW,
            tile_hw=tile_hw,
            needs_mask=needs_mask,
            inv_hw=1.0 / HW,
        )
        out = pl.pallas_call(
            kernel,
            out_shape=jax.ShapeDtypeStruct((RC, 1), x.dtype),
            grid_spec=pltpu.PrefetchScalarGridSpec(
                num_scalar_prefetch=0,
                grid=grid,
                in_specs=[pl.BlockSpec((tile_rc, tile_hw), lambda r, h: (r, h))],
                # Same output block across the HW axis -> resident accumulator,
                # written once on the last HW tile.
                out_specs=pl.BlockSpec((tile_rc, 1), lambda r, h: (r, 0)),
                scratch_shapes=[pltpu.VMEM((tile_rc, 1), jnp.float32)],
            ),
            compiler_params=pltpu.CompilerParams(
                dimension_semantics=("parallel", "arbitrary"),
                vmem_limit_bytes=_VMEM_LIMIT_BYTES,
            ),
            cost_estimate=cost,
        )(x2)

    return out.reshape(N, C)


if __name__ == "__main__":
    key = jax.random.PRNGKey(0)
    k1, k2 = jax.random.split(key)

    # Spec-consistent small shape (single full-HW row block).
    N, C, H, W = 2, 4, 16, 16
    x = jax.random.normal(k1, (N, C, H, W), dtype=jnp.float32)
    out = jax.block_until_ready(global_avg_pool2d(x))
    ref = jnp.mean(x, axis=(2, 3))
    assert out.shape == (N, C), out.shape
    assert jnp.allclose(out, ref, atol=1e-5, rtol=1e-5), (out, ref)

    # Second small shape: multiple "parallel" row blocks, non-128-aligned HW.
    N2, C2, H2, W2 = 2, 32, 13, 13
    x2 = jax.random.normal(k2, (N2, C2, H2, W2), dtype=jnp.float32)
    out2 = jax.block_until_ready(global_avg_pool2d(x2))
    ref2 = jnp.mean(x2, axis=(2, 3))
    assert out2.shape == (N2, C2), out2.shape
    assert jnp.allclose(out2, ref2, atol=1e-5, rtol=1e-5), (out2, ref2)

    print("KERNEL_OK")
</pallas_src>

<mosaic_0001>
module attributes {stable_mosaic.version = 11 : i64} {
  func.func @_gap_rows_kernel(%arg0: i32, %arg1: memref<8x256xf32, #tpu.memory_space<vmem>>, %arg2: memref<8x1xf32, #tpu.memory_space<vmem>>) attributes {dimension_semantics = [#tpu.dimension_semantics<parallel>], iteration_bounds = array<i64: 1>, scalar_prefetch = 0 : i64, scratch_operands = 0 : i64, tpu.core_type = #tpu.core_type<tc>, window_params = [{transform_indices = @transform_0, window_bounds = array<i64: 8, 256>}, {transform_indices = @transform_1, window_bounds = array<i64: 8, 1>}]} {
    %c0 = arith.constant 0 : index
    %c0_0 = arith.constant 0 : index
    %0 = vector.load %arg1[%c0, %c0_0] : memref<8x256xf32, #tpu.memory_space<vmem>>, vector<8x256xf32>
    %cst = arith.constant dense<0.000000e+00> : vector<8xf32>
    %1 = vector.multi_reduction <add>, %0, %cst [1] : vector<8x256xf32> to vector<8xf32>
    %2 = vector.shape_cast %1 : vector<8xf32> to vector<8x1xf32>
    %cst_1 = arith.constant 3.906250e-03 : f32
    %3 = vector.broadcast %cst_1 : f32 to vector<8x1xf32>
    %4 = arith.mulf %2, %3 : vector<8x1xf32>
    %c0_2 = arith.constant 0 : index
    %c0_3 = arith.constant 0 : index
    %5 = vector.load %arg2[%c0_2, %c0_3] : memref<8x1xf32, #tpu.memory_space<vmem>>, vector<8x1xf32>
    tpu.vector_store %arg2[%c0_2, %c0_3], %4 {strides = array<i32>} : memref<8x1xf32, #tpu.memory_space<vmem>>, vector<8x1xf32>,
    return
  }
  func.func @transform_0(%arg0: i32) -> (i32, i32) {
    %c0_i32 = arith.constant 0 : i32
    %c0_i32_0 = arith.constant 0 : i32
    return %arg0, %c0_i32 : i32, i32
  }
  func.func @transform_1(%arg0: i32) -> (i32, i32) {
    %c0_i32 = arith.constant 0 : i32
    %c0_i32_0 = arith.constant 0 : i32
    return %arg0, %c0_i32 : i32, i32
  }
}

</mosaic_0001>

<bundles_post_ra>
// kernel: tpu_custom_call.1
= control target key start
LH: loop header
LB: loop body
LE: loop exit
PB: predicated region body
PF: predicated region fallthrough
CT: control target
= control target key end

     0   :  { %6 = vsyncpa [#allocation3], 0  ;;  %s62_s9 = smov [#allocation2]   ;;  %s79_s0 = inlined_call_operand.hbm [shape: f32[8,256], index: 0, kind: input, shape index: {}]   ;;  %s80_s1 = inlined_call_operand.vmem [shape: f32[8,1], index: 1, kind: output, shape index: {}]  }
   0x1   :  { %s12_s8 = sshll.u32 %s79_s0, 4  ;;  %s14_s10 = sshll.u32 %s62_s9, 4  ;;  %s13_s8 = int_to_ptr.hbm [resolvable:$true] %s12_s8  ;;  %s15_s10 = int_to_ptr.vmem [resolvable:$true] %s14_s10 }
   0x2   :  { %17 = dma.hbm_to_vmem [thread:$0]  %s13_s8, 256, %s15_s10, [#allocation3]  }
   0x3   :  { %60 = dma.done.wait [#allocation3], 256  }
   0x4   :  { %61 = vsyncadd [#allocation3], 4294967040  ;;  %v22_v0 = vld [vmem:[#allocation2] sm:$0xff]  ;;  %v23_v1 = vld [vmem:[#allocation2 + $0x8] sm:$0xff]  ;;  %vm28_vm0 = vcmask 7168  }
   0x5   :  { %v24_v2 = vadd.f32 %v23_v1, %v22_v0 }
   0x7   :  { %25 = vadd.xlane.f32.xlu0 %v24_v2 }
  0x7a   :  { %v26_v3 = vpop.xlane.xlu0 %25 }
  0x7b   :  { %v27_v4 = vmul.f32 0.00390625, %v26_v3 }
  0x7d   :  { %29 = vst.msk [vmem:[%s80_s1] sm:$0xff] %vm28_vm0, %v27_v4 }
  0x7e   :  { %34 = vsyncpa [#allocation3], 1 }

</bundles_post_ra>
